<compile_context>
chip_gen: v7x
topology: tpu7x:2x2x1
jax: 0.10.0
libtpu: 0.0.40
codegen_flags: <defaults>
</compile_context>

<pallas_src>
import functools

import jax
import jax.numpy as jnp
from jax.experimental import pallas as pl
from jax.experimental.pallas import tpu as pltpu

IN_DIM = 10
HID_DIM = 20
OUT_DIM = 1
LANE = 128                                   # lane width: batch-tile granularity
_DOT_PREC = jax.lax.Precision.HIGHEST        # exact-f32 MXU passes


def _mlp_kernel(x_ref, w1_ref, b1_ref, w2_ref, b2_ref, o_ref):
    # x_ref : (IN_DIM, TB)        batch on the 128-lane axis (f32 or bf16)
    # w1_ref: (HID_DIM, IN_DIM)   torch (out, in) layout, VMEM-resident
    # b1_ref: (HID_DIM, 1)        VMEM-resident
    # w2_ref: (OUT_DIM, HID_DIM)  VMEM-resident
    # b2_ref: (1, 1)              scalar in SMEM
    # o_ref : (OUT_DIM, TB)       lane-dense output tile
    x = x_ref[...].astype(jnp.float32)       # bf16 input path upcasts on the VPU
    h = jnp.dot(w1_ref[...], x,
                preferred_element_type=jnp.float32, precision=_DOT_PREC)
    h = jnp.maximum(h + b1_ref[...], 0.0)
    y = jnp.dot(w2_ref[...], h,
                preferred_element_type=jnp.float32, precision=_DOT_PREC)
    o_ref[...] = jax.nn.sigmoid(y + b2_ref[0, 0])


def _round_up(n: int, m: int) -> int:
    return ((n + m - 1) // m) * m


@functools.partial(jax.jit, static_argnames=("tb", "x_feature_major", "use_bf16"))
def adaptive_learning_forward(x, w1, b1, w2, b2, *, tb: int = 32768,
                              x_feature_major: bool = False,
                              use_bf16: bool = False):
    """Forward pass of AdaptiveLearningModel.

    x: (B, 10) f32 (torch layout), or (10, B) if x_feature_major=True (zero-copy
       fast path: no wrapper transpose is materialized).
    Returns (B, 1) f32.
    """
    if x_feature_major:
        in_dim, B = x.shape
    else:
        B, in_dim = x.shape
    if in_dim != IN_DIM:
        raise ValueError(f"expected feature dim {IN_DIM}, got {in_dim}")

    x_dtype = jnp.bfloat16 if use_bf16 else jnp.float32
    # Single fused (cast+)transpose pass; no zero-fill / dynamic-update-slice,
    # and no padding: boundary grid blocks overhang B, the extra lanes hold
    # unspecified data that stays lane-confined and is dropped on writeback.
    xt = x.astype(x_dtype) if x_feature_major else x.astype(x_dtype).T
    # TODO(synk): an in-kernel XLU transpose of natural-layout (tb, 10) blocks
    # would remove even this one transpose pass, at a 12.8x VMEM blowup per x
    # buffer; the x_feature_major fast path covers the zero-copy case instead.

    # ---- batch tiling ----------------------------------------------------
    b_lanes = _round_up(max(B, 1), LANE)
    tb = min(_round_up(max(int(tb), LANE), LANE), b_lanes)
    # v7x has 2 TensorCores: make sure a multi-lane-tile batch yields >= 2
    # grid blocks so the "parallel" axis can feed both cores.
    if b_lanes > LANE and tb >= b_lanes:
        tb = _round_up(pl.cdiv(b_lanes, 2), LANE)
    grid = (pl.cdiv(B, tb),)

    w1c = w1.astype(jnp.float32)
    b1c = b1.reshape(HID_DIM, 1).astype(jnp.float32)
    w2c = w2.astype(jnp.float32)
    b2c = b2.reshape(1, 1).astype(jnp.float32)

    # x block pads IN_DIM=10 -> 16 sublanes, output 1 -> 8; both double-buffered.
    vmem_need = 2 * (16 + 8) * 4 * tb + (2 << 20)
    vmem_limit = int(min(max(vmem_need, 32 << 20), 60 << 20))

    x_bytes = 2 if use_bf16 else 4
    weight_bytes = 4 * (HID_DIM * IN_DIM + HID_DIM + OUT_DIM * HID_DIM + OUT_DIM)
    cost = pl.CostEstimate(
        flops=2 * B * (IN_DIM * HID_DIM + HID_DIM * OUT_DIM),
        transcendentals=B * OUT_DIM,
        bytes_accessed=B * (x_bytes * IN_DIM + 4 * OUT_DIM) + weight_bytes,
    )

    out_t = pl.pallas_call(
        _mlp_kernel,
        out_shape=jax.ShapeDtypeStruct((OUT_DIM, B), jnp.float32),
        grid=grid,
        in_specs=[
            pl.BlockSpec((IN_DIM, tb), lambda i: (0, i)),        # x batch tile
            pl.BlockSpec((HID_DIM, IN_DIM), lambda i: (0, 0)),   # W1 (resident)
            pl.BlockSpec((HID_DIM, 1), lambda i: (0, 0)),        # b1 (resident)
            pl.BlockSpec((OUT_DIM, HID_DIM), lambda i: (0, 0)),  # W2 (resident)
            pl.BlockSpec(memory_space=pltpu.MemorySpace.SMEM),   # b2 scalar
        ],
        out_specs=pl.BlockSpec((OUT_DIM, tb), lambda i: (0, i)),
        compiler_params=pltpu.CompilerParams(
            dimension_semantics=("parallel",),
            vmem_limit_bytes=vmem_limit,
        ),
        cost_estimate=cost,
    )(xt, w1c, b1c, w2c, b2c)

    return out_t.T  # (B, OUT_DIM)


def init_params(key):
    """Deterministic init mirroring nn.Linear's U(-1/sqrt(fan_in), 1/sqrt(fan_in)).
    Weights kept in torch (out_features, in_features) layout."""
    k1, k2, k3, k4 = jax.random.split(key, 4)
    lim1 = 1.0 / jnp.sqrt(jnp.float32(IN_DIM))
    lim2 = 1.0 / jnp.sqrt(jnp.float32(HID_DIM))
    w1 = jax.random.uniform(k1, (HID_DIM, IN_DIM), jnp.float32, -lim1, lim1)
    b1 = jax.random.uniform(k2, (HID_DIM,), jnp.float32, -lim1, lim1)
    w2 = jax.random.uniform(k3, (OUT_DIM, HID_DIM), jnp.float32, -lim2, lim2)
    b2 = jax.random.uniform(k4, (OUT_DIM,), jnp.float32, -lim2, lim2)
    return w1, b1, w2, b2


if __name__ == "__main__":
    key = jax.random.PRNGKey(0)
    kx, kp = jax.random.split(key)
    w1, b1, w2, b2 = init_params(kp)

    def reference(xv):
        h = jnp.maximum(jnp.dot(xv, w1.T, precision=_DOT_PREC) + b1, 0.0)
        return jax.nn.sigmoid(jnp.dot(h, w2.T, precision=_DOT_PREC) + b2)

    # 1) tiny batch (single block) and 2) ragged batch exercising the
    #    multi-block grid with a boundary (overhanging) block.
    for B, tb in ((8, 1024), (300, 32768)):
        x = jax.random.normal(jax.random.fold_in(kx, B), (B, IN_DIM), jnp.float32)
        out = jax.block_until_ready(
            adaptive_learning_forward(x, w1, b1, w2, b2, tb=tb))
        ref = reference(x)
        assert out.shape == (B, OUT_DIM)
        assert jnp.allclose(out, ref, atol=5e-4, rtol=0.0)

    # 3) feature-major producer path: no wrapper transpose is materialized.
    x = jax.random.normal(jax.random.fold_in(kx, 7), (300, IN_DIM), jnp.float32)
    out_fm = jax.block_until_ready(
        adaptive_learning_forward(x.T, w1, b1, w2, b2, tb=256,
                                  x_feature_major=True))
    assert out_fm.shape == (300, OUT_DIM)
    assert jnp.allclose(out_fm, reference(x), atol=5e-4, rtol=0.0)

    # 4) bf16 input-read path (halves the dominant HBM stream; looser numerics).
    out_bf = jax.block_until_ready(
        adaptive_learning_forward(x, w1, b1, w2, b2, use_bf16=True))
    assert jnp.allclose(out_bf, reference(x), atol=5e-3, rtol=0.0)

    print("KERNEL_OK")
</pallas_src>

<mosaic_0001>
module attributes {stable_mosaic.version = 11 : i64} {
  func.func @_mlp_kernel(%arg0: i32, %arg1: memref<10x128xf32, #tpu.memory_space<vmem>>, %arg2: memref<20x10xf32, #tpu.memory_space<vmem>>, %arg3: memref<20x1xf32, #tpu.memory_space<vmem>>, %arg4: memref<1x20xf32, #tpu.memory_space<vmem>>, %arg5: memref<1x1xf32, #tpu.memory_space<smem>>, %arg6: memref<1x128xf32, #tpu.memory_space<vmem>>) attributes {dimension_semantics = [#tpu.dimension_semantics<parallel>], iteration_bounds = array<i64: 1>, scalar_prefetch = 0 : i64, scratch_operands = 0 : i64, tpu.core_type = #tpu.core_type<tc>, window_params = [{transform_indices = @transform_0, window_bounds = array<i64: 10, 128>}, {pipeline_mode = #tpu.pipeline_mode<synchronous>, transform_indices = @transform_1, window_bounds = array<i64: 20, 10>}, {pipeline_mode = #tpu.pipeline_mode<synchronous>, transform_indices = @transform_2, window_bounds = array<i64: 20, 1>}, {pipeline_mode = #tpu.pipeline_mode<synchronous>, transform_indices = @transform_3, window_bounds = array<i64: 1, 20>}, {transform_indices = @transform_4, window_bounds = array<i64: 1, 1>}, {transform_indices = @transform_5, window_bounds = array<i64: 1, 128>}]} {
    %c0 = arith.constant 0 : index
    %c0_0 = arith.constant 0 : index
    %0 = vector.load %arg1[%c0, %c0_0] : memref<10x128xf32, #tpu.memory_space<vmem>>, vector<10x128xf32>
    %c0_1 = arith.constant 0 : index
    %c0_2 = arith.constant 0 : index
    %1 = vector.load %arg2[%c0_1, %c0_2] : memref<20x10xf32, #tpu.memory_space<vmem>>, vector<20x10xf32>
    %cst = arith.constant dense<0.000000e+00> : vector<20x128xf32>
    %2 = tpu.matmul %1, %0, %cst {dimension_numbers = #tpu.dot_dimension_numbers<[1], [0], [0], [1], [0, 0, 1, 1], [], []>, precision = #tpu.contract_precision<fp32>} : vector<20x10xf32>, vector<10x128xf32>, vector<20x128xf32> -> vector<20x128xf32>
    %c0_3 = arith.constant 0 : index
    %c0_4 = arith.constant 0 : index
    %3 = vector.load %arg3[%c0_3, %c0_4] : memref<20x1xf32, #tpu.memory_space<vmem>>, vector<20x1xf32>
    %4 = vector.broadcast %3 : vector<20x1xf32> to vector<20x128xf32>
    %5 = arith.addf %2, %4 : vector<20x128xf32>
    %cst_5 = arith.constant 0.000000e+00 : f32
    %6 = vector.broadcast %cst_5 : f32 to vector<20x128xf32>
    %7 = arith.maximumf %5, %6 : vector<20x128xf32>
    %c0_6 = arith.constant 0 : index
    %c0_7 = arith.constant 0 : index
    %8 = vector.load %arg4[%c0_6, %c0_7] : memref<1x20xf32, #tpu.memory_space<vmem>>, vector<1x20xf32>
    %cst_8 = arith.constant dense<0.000000e+00> : vector<1x128xf32>
    %9 = tpu.matmul %8, %7, %cst_8 {dimension_numbers = #tpu.dot_dimension_numbers<[1], [0], [0], [1], [0, 0, 1, 1], [], []>, precision = #tpu.contract_precision<fp32>} : vector<1x20xf32>, vector<20x128xf32>, vector<1x128xf32> -> vector<1x128xf32>
    %c0_9 = arith.constant 0 : index
    %c0_10 = arith.constant 0 : index
    %10 = memref.load %arg5[%c0_9, %c0_10] : memref<1x1xf32, #tpu.memory_space<smem>>
    %11 = vector.broadcast %10 : f32 to vector<1x128xf32>
    %12 = arith.addf %9, %11 : vector<1x128xf32>
    %13 = arith.negf %12 : vector<1x128xf32>
    %14 = math.exp %13 : vector<1x128xf32>
    %cst_11 = arith.constant 1.000000e+00 : f32
    %15 = vector.broadcast %cst_11 : f32 to vector<1x128xf32>
    %16 = arith.addf %15, %14 : vector<1x128xf32>
    %17 = arith.divf %15, %16 : vector<1x128xf32>
    %c0_12 = arith.constant 0 : index
    %c0_13 = arith.constant 0 : index
    %18 = vector.load %arg6[%c0_12, %c0_13] : memref<1x128xf32, #tpu.memory_space<vmem>>, vector<1x128xf32>
    tpu.vector_store %arg6[%c0_12, %c0_13], %17 {strides = array<i32>} : memref<1x128xf32, #tpu.memory_space<vmem>>, vector<1x128xf32>,
    return
  }
  func.func @transform_0(%arg0: i32) -> (i32, i32) {
    %c0_i32 = arith.constant 0 : i32
    %c0_i32_0 = arith.constant 0 : i32
    return %c0_i32, %arg0 : i32, i32
  }
  func.func @transform_1(%arg0: i32) -> (i32, i32) {
    %c0_i32 = arith.constant 0 : i32
    %c0_i32_0 = arith.constant 0 : i32
    %c0_i32_1 = arith.constant 0 : i32
    return %c0_i32, %c0_i32_0 : i32, i32
  }
  func.func @transform_2(%arg0: i32) -> (i32, i32) {
    %c0_i32 = arith.constant 0 : i32
    %c0_i32_0 = arith.constant 0 : i32
    %c0_i32_1 = arith.constant 0 : i32
    return %c0_i32, %c0_i32_0 : i32, i32
  }
  func.func @transform_3(%arg0: i32) -> (i32, i32) {
    %c0_i32 = arith.constant 0 : i32
    %c0_i32_0 = arith.constant 0 : i32
    %c0_i32_1 = arith.constant 0 : i32
    return %c0_i32, %c0_i32_0 : i32, i32
  }
  func.func @transform_4(%arg0: i32) -> (i32, i32) {
    %c0_i32 = arith.constant 0 : i32
    %c0_i32_0 = arith.constant 0 : i32
    %c0_i32_1 = arith.constant 0 : i32
    return %c0_i32, %c0_i32_0 : i32, i32
  }
  func.func @transform_5(%arg0: i32) -> (i32, i32) {
    %c0_i32 = arith.constant 0 : i32
    %c0_i32_0 = arith.constant 0 : i32
    return %c0_i32, %arg0 : i32, i32
  }
}

</mosaic_0001>

<bundles_post_ra>
// kernel: adaptive_learning_forward.1
= control target key start
LH: loop header
LB: loop body
LE: loop exit
PB: predicated region body
PF: predicated region fallthrough
CT: control target
= control target key end

     0   :  { %vm55_vm0 = vcmask 1041408   ;;  %v1412_v2 = vmov 0.0|0.0   ;;  %vm45_vm1 = vcmask 80896   ;;  %vm1413_vm2 = vmmov 0   ;;  %s1590_s0 = inlined_call_operand.vmem [shape: f32[10,8], index: 0, kind: input, shape index: {}]   ;;  %s1591_s1 = inlined_call_operand.vmem [shape: f32[20,10], index: 1, kind: input, shape index: {}]   ;;  %s1592_s2 = inlined_call_operand.vmem [shape: f32[20,1], index: 2, kind: input, shape index: {}]   ;;  %s1593_s3 = inlined_call_operand.vmem [shape: f32[1,20], index: 3, kind: input, shape index: {}]   ;;  %s1594_s4 = inlined_call_operand.<no memory space> [shape: f32[1,1], index: 4, kind: input, shape index: {}]   ;;  %s1595_s5 = inlined_call_operand.hbm [shape: f32[1,8], index: 5, kind: output, shape index: {}]  }
   0x1   :  { %v22_v0 = vld [vmem:[%s1590_s0] sm:$0xff]  ;;  %v23_v1 = vld [vmem:[%s1590_s0 + $0x8] sm:$0x3]  ;;  %1301 = vmatprep.subr.bf16.mxu0 %v1412_v2  ;;  %1298 = vmatprep.subr.bf16.mxu1 %v1412_v2  ;;  %v1414_v8 = vmov 0.0   ;;  %v26_v11 = vld [vmem:[%s1591_s1 + $0x10] sm:$0xf] }
   0x2   :  { %v57_v3 = vsel %vm55_vm0, %v23_v1, 0  ;;  %v60_v4 = vand.u32 4294901760, %v22_v0  ;;  %v24_v5 = vld [vmem:[%s1591_s1] sm:$0xff]  ;;  %v25_v6 = vld [vmem:[%s1591_s1 + $0x8] sm:$0xff]  ;;  %1183 = vmatprep.mubr.msk.f32.mxu0 %vm1413_vm2, %v1414_v8  ;;  %1170 = vmatprep.mubr.msk.f32.mxu1 %vm1413_vm2, %v1414_v8  ;;  %v53_v15 = vsel %vm45_vm1, %v26_v11, 0  ;;  %v1415_v16 = vmov 0  }
   0x3   :  { %v63_v7 = vand.u32 4294901760, %v57_v3  ;;  %v47_v9 = vsel %vm45_vm1, %v24_v5, 0  ;;  %v50_v10 = vsel %vm45_vm1, %v25_v6, 0  ;;  %1382 = vset.pattern.permute.xlu0 %v1415_v16  ;;  %v27_v17 = vld [vmem:[%s1592_s2] sm:$0xff]  ;;  %1383 = vset.pattern.permute.xlu1 %v1415_v16  ;;  %v1479_v20 = vand.u32 4294901760, %v53_v15 }
   0x4   :  { %v1468_v12 = vsub.f32 %v22_v0, %v60_v4  ;;  %v1470_v13 = vand.u32 4294901760, %v47_v9  ;;  %v1472_v14 = vand.u32 4294901760, %v50_v10  ;;  %32 = vperm.xlu0 %1382, %v27_v17   ;;  %v29_v21 = vld [vmem:[%s1592_s2 + $0x10] sm:$0xf] }
   0x5   :  { %v165_v18 = vsub.f32 %v57_v3, %v63_v7  ;;  %v1477_v19 = vpack.c.bf16 %v63_v7, %v60_v4 }
   0x6   :  { %11 = vsyncpa [#allocation4], 0  ;;  %v159_v22 = vand.u32 4294901760, %v1468_v12  ;;  %v127_v23 = vsub.f32 %v47_v9, %v1470_v13  ;;  %v137_v24 = vsub.f32 %v50_v10, %v1472_v14  ;;  %v28_v25 = vld [vmem:[%s1592_s2 + $0x8] sm:$0xff]  ;;  %42 = vperm.xlu1 %1383, %v29_v21   ;;  %v147_v28 = vsub.f32 %v53_v15, %v1479_v20  ;;  %v607_v50 = vld [vmem:[%s1593_s3] sm:$0x1] }
   0x7   :  { %v166_v26 = vand.u32 4294901760, %v165_v18  ;;  %1300 = vmatpush3.bf16.msra.mxu1 %v1477_v19  ;;  %v1305_v41 = vpack.c.bf16 %v165_v18, %v1468_v12  ;;  %vm610_vm3 = vcmask 162816   ;;  %vm614_vm4 = vcmask 1043456   ;;  %s1416_s9 = smov [#allocation3]  }
   0x8   :  { %v160_v27 = vsub.f32 %v1468_v12, %v159_v22  ;;  %v128_v29 = vand.u32 4294901760, %v127_v23  ;;  %v138_v30 = vand.u32 4294901760, %v137_v24  ;;  %1334 = vmatprep.subr.bf16.mxu1 %v1412_v2  ;;  %37 = vperm.xlu0 %1382, %v28_v25   ;;  %v148_v34 = vand.u32 4294901760, %v147_v28  ;;  %s1103_s10 = sshll.u32 %s1416_s9, 4  ;;  %s1104_s10 = int_to_ptr.vmem [resolvable:$true] %s1103_s10 }
   0x9   :  { %v167_v31 = vsub.f32 %v165_v18, %v166_v26  ;;  %v1311_v43 = vpack.c.bf16 %v166_v26, %v159_v22  ;;  %v612_v52 = vsel %vm610_vm3, %v607_v50, 0  ;;  %s1388_s11 = scalar_lea.vmem %s1104_s10, 16  ;;  %s1392_s12 = scalar_lea.vmem %s1104_s10, 32 }
   0xa   :  { %v161_v32 = vand.u32 4294901760, %v160_v27  ;;  %v129_v33 = vsub.f32 %v127_v23, %v128_v29  ;;  %v139_v35 = vsub.f32 %v137_v24, %v138_v30  ;;  %v149_v40 = vsub.f32 %v147_v28, %v148_v34  ;;  %p1389_p0 = scmp.ne.s32.totalorder %s1104_s10, %s1388_s11  ;;  %p1393_p1 = scmp.lt.s32.totalorder %s1104_s10, %s1104_s10 }
   0xb   :  { %v168_v36 = vand.u32 4294901760, %v167_v31  ;;  %v1548_v53 = vand.u32 4294901760, %v612_v52  ;;  %p1394_p2 = scmp.lt.s32.totalorder %s1392_s12, %s1388_s11 }
   0xc   :  { %v130_v37 = vand.u32 4294901760, %v129_v33  ;;  %v140_v39 = vand.u32 4294901760, %v139_v35  ;;  %v150_v42 = vand.u32 4294901760, %v149_v40  ;;  %v609_v33 = vstv %s1594_s4 }
   0xd   :  { %v1302_v38 = vpack.c.bf16 %v168_v36, %v161_v32  ;;  %v687_v59 = vsub.f32 %v612_v52, %v1548_v53  ;;  %p1395_p3 = por %p1394_p2, %p1393_p1 }
   0xe   :  { %1171 = vmatmul.mubr.f32.vlgmr.msra.gmra.mrb[0].mxu1 %v130_v37 }
   0xf   :  { %1303 = vmatpush3.bf16.msra.mxu0 %v1302_v38  ;;  %1173 = vmatprep.mubr.msk.f32.mxu1 %vm1413_vm2, %v1414_v8  ;;  %v688_v4 = vand.u32 4294901760, %v687_v59  ;;  %p1396_p4 = pnand %p1395_p3, %p1389_p0 }
  0x10   :  { %1304 = vmatprep.subr.bf16.mxu0 %v1412_v2  ;;  %1335 = vmatpush3.bf16.msra.mxu1 %v1302_v38 }
  0x11   :  { %1316 = vmatprep.subr.bf16.mxu1 %v1412_v2 }
  0x12   :  { %1184 = vmatmul.mubr.f32.vlgmr.msra.gmra.mrb[0].mxu0 %v1470_v13  ;;  %1174 = vmatmul.mubr.f32.gmra.mrb[2].mxu1 %v140_v39 }
  0x13   :  { %1306 = vmatpush3.bf16.msra.mxu0 %v1305_v41  ;;  %1196 = vmatprep.mubr.msk.f32.mxu0 %vm1413_vm2, %v1414_v8 }
  0x14   :  { %1307 = vmatprep.subr.bf16.mxu0 %v1412_v2  ;;  %1176 = vmatprep.mubr.msk.f32.mxu1 %vm1413_vm2, %v1414_v8 }
  0x16   :  { %1177 = vmatmul.mubr.f32.gmra.mrb[4].mxu1 %v150_v42 }
  0x17   :  { %1186 = vmatprep.mubr.msk.f32.mxu1 %vm1413_vm2, %v1414_v8 }
  0x1a   :  { %1197 = vmatmul.mubr.f32.vlgmr.msra.gmra.mrb[0].mxu0 %v127_v23  ;;  %1187 = vmatmul.mubr.f32.vlgmr.msra.gmra.mrb[2].mxu1 %v1472_v14 }
  0x1b   :  { %1199 = vmatprep.mubr.msk.f32.mxu0 %vm1413_vm2, %v1414_v8  ;;  %1309 = vmatpush3.bf16.msra.mxu0 %v1477_v19 }
  0x1c   :  { %1310 = vmatprep.subr.bf16.mxu0 %v1412_v2  ;;  %1189 = vmatprep.mubr.msk.f32.mxu1 %vm1413_vm2, %v1414_v8 }
  0x1e   :  { %1200 = vmatmul.mubr.f32.gmra.mrb[2].mxu0 %v137_v24  ;;  %1190 = vmatmul.mubr.f32.gmra.mrb[4].mxu1 %v1479_v20 }
  0x1f   :  { %1202 = vmatprep.mubr.msk.f32.mxu0 %vm1413_vm2, %v1414_v8  ;;  %1250 = vmatprep.mubr.msk.f32.mxu1 %vm1413_vm2, %v1414_v8 }
  0x22   :  { %1203 = vmatmul.mubr.f32.gmra.mrb[4].mxu0 %v147_v28 }
  0x23   :  { %1209 = vmatprep.mubr.msk.f32.mxu0 %vm1413_vm2, %v1414_v8 }
  0x26   :  { %1210 = vmatmul.mubr.f32.vlgmr.msra.gmra.mrb[0].mxu0 %v128_v29 }
  0x27   :  { %1212 = vmatprep.mubr.msk.f32.mxu0 %vm1413_vm2, %v1414_v8  ;;  %1312 = vmatpush3.bf16.msra.mxu0 %v1311_v43 }
  0x28   :  { %1313 = vmatprep.subr.bf16.mxu0 %v1412_v2 }
  0x2a   :  { %1213 = vmatmul.mubr.f32.gmra.mrb[2].mxu0 %v138_v30 }
  0x2b   :  { %1215 = vmatprep.mubr.msk.f32.mxu0 %vm1413_vm2, %v1414_v8 }
  0x2e   :  { %1216 = vmatmul.mubr.f32.gmra.mrb[4].mxu0 %v148_v34 }
  0x2f   :  { %1222 = vmatprep.mubr.msk.f32.mxu0 %vm1413_vm2, %v1414_v8 }
  0x32   :  { %1223 = vmatmul.mubr.f32.vlgmr.msra.gmra.mrb[0].mxu0 %v1470_v13 }
  0x33   :  { %1225 = vmatprep.mubr.msk.f32.mxu0 %vm1413_vm2, %v1414_v8  ;;  %1315 = vmatpush3.bf16.msra.mxu0 %v1477_v19 }
  0x36   :  { %1226 = vmatmul.mubr.f32.gmra.mrb[2].mxu0 %v1472_v14 }
  0x37   :  { %1228 = vmatprep.mubr.msk.f32.mxu0 %vm1413_vm2, %v1414_v8 }
  0x3a   :  { %1229 = vmatmul.mubr.f32.gmra.mrb[4].mxu0 %v1479_v20 }
  0x3b   :  { %1235 = vmatprep.mubr.msk.f32.mxu0 %vm1413_vm2, %v1414_v8 }
  0x3e   :  { %1236 = vmatmul.mubr.f32.vlgmr.msra.gmra.mrb[0].mxu0 %v1470_v13 }
  0x3f   :  { %1238 = vmatprep.mubr.msk.f32.mxu0 %vm1413_vm2, %v1414_v8 }
  0x42   :  { %1239 = vmatmul.mubr.f32.gmra.mrb[2].mxu0 %v1472_v14  ;;  %v689_v14 = vsub.f32 %v687_v59, %v688_v4 }
  0x43   :  { %1241 = vmatprep.mubr.msk.f32.mxu0 %vm1413_vm2, %v1414_v8 }
  0x44   :  { %v690_v23 = vand.u32 4294901760, %v689_v14 }
  0x46   :  { %1242 = vmatmul.mubr.f32.gmra.mrb[4].mxu0 %v1479_v20 }
  0x83   :  { %v33_v51 = vpop.permute.xlu0 %32 }
  0x85   :  { %v43_v62 = vpop.permute.xlu1 %42 }
  0x87   :  { %v38_v55 = vpop.permute.xlu0 %37 }
  0xe1   :  { %v132_v44 = vpop.f32.mrb[0].mxu1 }
  0xe2   :  { %v1172_v45 = vpop.f32.mrb[1].mxu1  ;;  %v133_v54 = vadd.f32 %v132_v44, %v33_v51 }
  0xed   :  { %v239_v46 = vpop.f32.mrb[2].mxu1 }
  0xee   :  { %v1188_v47 = vpop.f32.mrb[3].mxu1  ;;  %v1338_v60 = vadd.f32 %v239_v46, %v38_v55 }
  0xf1   :  { %v245_v48 = vpop.f32.mrb[4].mxu1 }
  0xf2   :  { %v1191_v49 = vpop.f32.mrb[5].mxu1  ;;  %v1340_v5 = vadd.f32 %v245_v48, %v43_v62 }
 0x111   :  { %v588_v56 = vpop.f32.mrb[0].mxu0 }
 0x112   :  { %v1337_v57 = vadd.f32 %v588_v56, %v133_v54  ;;  %v1237_v58 = vpop.f32.mrb[1].mxu0 }
 0x114   :  { %v604_v61 = vmax.f32 %v1337_v57, 0.0 }
 0x115   :  { %v594_v63 = vpop.f32.mrb[2].mxu0 }
 0x116   :  { %v619_v0 = vand.u32 4294901760, %v604_v61  ;;  %v1339_v1 = vadd.f32 %v1338_v60, %v594_v63  ;;  %v1240_v3 = vpop.f32.mrb[3].mxu0 }
 0x118   :  { %v698_v6 = vsub.f32 %v604_v61, %v619_v0  ;;  %v605_v7 = vmax.f32 %v1339_v1, 0.0 }
 0x119   :  { %v600_v9 = vpop.f32.mrb[4].mxu0 }
 0x11a   :  { %v699_v10 = vand.u32 4294901760, %v698_v6  ;;  %v622_v11 = vand.u32 4294901760, %v605_v7  ;;  %v1341_v12 = vadd.f32 %v1340_v5, %v600_v9  ;;  %v1243_v13 = vpop.f32.mrb[5].mxu0 }
 0x11c   :  { %v1317_v15 = vpack.c.bf16 %v622_v11, %v619_v0  ;;  %v705_v16 = vsub.f32 %v605_v7, %v622_v11  ;;  %v606_v17 = vmax.f32 %v1341_v12, 0.0  ;;  %v700_v18 = vsub.f32 %v698_v6, %v699_v10 }
 0x11e   :  { %v706_v19 = vand.u32 4294901760, %v705_v16  ;;  %v616_v20 = vsel %vm614_vm4, %v606_v17, 0  ;;  %1318 = vmatpush3.bf16.msra.mxu1 %v1317_v15  ;;  %v1323_v21 = vpack.c.bf16 %v705_v16, %v698_v6  ;;  %v701_v27 = vand.u32 4294901760, %v700_v18 }
 0x11f   :  { %v625_v22 = vand.u32 4294901760, %v616_v20  ;;  %1248 = vmatprep.subr.mxu1 %v1414_v8 }
 0x120   :  { %v707_v24 = vsub.f32 %v705_v16, %v706_v19  ;;  %v1329_v25 = vpack.c.bf16 %v706_v19, %v699_v10 }
 0x121   :  { %v712_v26 = vsub.f32 %v616_v20, %v625_v22 }
 0x122   :  { %v708_v28 = vand.u32 4294901760, %v707_v24  ;;  %1249 = vmatpush3.msra.mxu1 %v625_v22 }
 0x123   :  { %v713_v29 = vand.u32 4294901760, %v712_v26  ;;  %1251 = vmatmul.mubr.f32.vlgmr.msra.gmra.mrb[6].mxu1 %v690_v23  ;;  %1319 = vmatprep.subr.bf16.mxu1 %v1412_v2 }
 0x124   :  { %v1320_v30 = vpack.c.bf16 %v708_v28, %v701_v27  ;;  %1259 = vmatprep.mubr.msk.f32.mxu1 %vm1413_vm2, %v1414_v8 }
 0x125   :  { %v714_v31 = vsub.f32 %v712_v26, %v713_v29 }
 0x126   :  { %1321 = vmatpush3.bf16.msra.mxu1 %v1320_v30 }
 0x127   :  { %1257 = vmatprep.subr.mxu1 %v1414_v8  ;;  %v715_v32 = vand.u32 4294901760, %v714_v31 }
 0x12a   :  { %1258 = vmatpush3.msra.mxu1 %v715_v32 }
 0x12b   :  { %1260 = vmatmul.mubr.f32.vlgmr.msra.gmra.mrb[6].mxu1 %v1548_v53  ;;  %1322 = vmatprep.subr.bf16.mxu1 %v1412_v2 }
 0x12c   :  { %1324 = vmatpush3.bf16.msra.mxu1 %v1323_v21  ;;  %1268 = vmatprep.mubr.msk.f32.mxu1 %vm1413_vm2, %v1414_v8 }
 0x12d   :  { %1266 = vmatprep.subr.mxu1 %v1414_v8 }
 0x130   :  { %1267 = vmatpush3.msra.mxu1 %v712_v26 }
 0x131   :  { %1325 = vmatprep.subr.bf16.mxu1 %v1412_v2 }
 0x133   :  { %1269 = vmatmul.mubr.f32.vlgmr.msra.gmra.mrb[6].mxu1 %v687_v59 }
 0x134   :  { %1327 = vmatpush3.bf16.msra.mxu1 %v1317_v15  ;;  %1277 = vmatprep.mubr.msk.f32.mxu1 %vm1413_vm2, %v1414_v8 }
 0x135   :  { %1275 = vmatprep.subr.mxu1 %v1414_v8 }
 0x138   :  { %1276 = vmatpush3.msra.mxu1 %v625_v22 }
 0x139   :  { %1328 = vmatprep.subr.bf16.mxu1 %v1412_v2 }
 0x13b   :  { %1278 = vmatmul.mubr.f32.vlgmr.msra.gmra.mrb[6].mxu1 %v688_v4 }
 0x13c   :  { %1330 = vmatpush3.bf16.msra.mxu1 %v1329_v25  ;;  %1286 = vmatprep.mubr.msk.f32.mxu1 %vm1413_vm2, %v1414_v8 }
 0x13d   :  { %1284 = vmatprep.subr.mxu1 %v1414_v8 }
 0x140   :  { %1285 = vmatpush3.msra.mxu1 %v713_v29 }
 0x141   :  { %1331 = vmatprep.subr.bf16.mxu1 %v1412_v2 }
 0x143   :  { %1287 = vmatmul.mubr.f32.vlgmr.msra.gmra.mrb[6].mxu1 %v1548_v53 }
 0x144   :  { %1333 = vmatpush3.bf16.msra.mxu1 %v1317_v15  ;;  %1295 = vmatprep.mubr.msk.f32.mxu1 %vm1413_vm2, %v1414_v8 }
 0x145   :  { %1293 = vmatprep.subr.mxu1 %v1414_v8 }
 0x148   :  { %1294 = vmatpush3.msra.mxu1 %v625_v22 }
 0x14b   :  { %1296 = vmatmul.mubr.f32.vlgmr.msra.gmra.mrb[6].mxu1 %v1548_v53 }
 0x21e   :  { %v1086_v34 = vpop.f32.mrb[6].mxu1 }
 0x21f   :  { %v1342_v35 = vadd.f32 %v1086_v34, %v609_v33  ;;  %v1297_v36 = vpop.f32.mrb[7].mxu1 }
 0x221   :  { %v1111_v37 = vmul.f32 -1.442695, %v1342_v35 }
 0x223   :  { %1384 = vpow2.f32 %v1111_v37 }
 0x22d   :  { %v1385_v2 = vpop.eup %1384 }
 0x22e   :  { %v1093_v38 = vadd.f32 1.0, %v1385_v2 }
 0x230   :  { %1386 = vrcp.f32 %v1093_v38 }
 0x23a   :  { %v1387_v39 = vpop.eup %1386 }
 0x23b   :  { %1096 = vst [vmem:[#allocation3] sm:$0x1] %v1387_v39 }
 0x23c   :  { %1399 = shalt.err (!%p1396_p4)
}
 0x23d   :  { %s1400_s14 = scalar_lea.hbm %s1595_s5, 16 }
 0x23e   :  { %p1401_p5 = scmp.ne.s32.totalorder %s1595_s5, %s1400_s14  ;;  %p1404_p6 = scmp.lt.u32.totalorder %s1400_s14, %s1595_s5 }
 0x240   :  { %p1406_p7 = pnand %p1404_p6, %p1401_p5 }
 0x242   :  { %1409 = shalt.err (!%p1406_p7)
}
 0x243   :  { %1106 = dma.vmem_to_hbm [thread:$0]  %s1104_s10, 16, %s1595_s5, [#allocation4]  }
 0x244   :  { %1410 = dma.done.wait [#allocation4], 16  }
 0x245   :  { %1411 = vsyncadd [#allocation4], 4294967280 }
 0x246   :  { %1110 = vsyncpa [#allocation4], 1 }

</bundles_post_ra>
